<compile_context>
chip_gen: v7x
topology: tpu7x:2x2x1
jax: 0.10.0
libtpu: 0.0.40
codegen_flags: <defaults>
</compile_context>

<pallas_src>
import jax
import jax.numpy as jnp
from jax.experimental import pallas as pl
from jax.experimental.pallas import tpu as pltpu

_LANES = 128
_SUBLANES = 8


def _cdiv(a, b):
    return -(-a // b)


def _round_up(a, b):
    return _cdiv(a, b) * b


def _exp_loss_kernel(x_ref, y_ref, d_ref, o_ref, acc_ref):
    # grid = (n_outer [parallel], n_inner [arbitrary reduction]).
    j = pl.program_id(1)

    @pl.when(j == 0)
    def _():
        acc_ref[...] = jnp.zeros_like(acc_ref)

    x = x_ref[...].astype(jnp.float32)
    y = y_ref[...].astype(jnp.float32)
    d = d_ref[...].astype(jnp.float32)
    a = jnp.exp(-(x * y)) * d

    # Fold the (tile_rows, 128) block into a vreg-shaped (8, 128) partial sum:
    # pure element-wise VPU adds on every step, no per-step XLU reduce and no
    # SMEM scalar read-modify-write chain.
    acc_ref[...] += a.reshape(-1, _SUBLANES, _LANES).sum(axis=0)

    @pl.when(j == pl.num_programs(1) - 1)
    def _():
        # One cross-sublane reduce per outer block -> lane-dense (1, 128) partial.
        o_ref[...] = jnp.sum(acc_ref[...], axis=0, keepdims=True)


def exponential_loss(x, y, D, train_dataset_len, *, tile_rows=4096):
    """Pallas equivalent of ExponentialLoss.forward(x, y, D)."""
    assert x.shape == y.shape == D.shape, "x, y, D must share a shape"
    B = x.shape[0]
    scale = jnp.float32(float(train_dataset_len) / float(B))

    itemsize = max(
        jnp.dtype(x.dtype).itemsize,
        jnp.dtype(y.dtype).itemsize,
        jnp.dtype(D.dtype).itemsize,
    )

    # Cap tile so 3 inputs x 2 pipeline buffers stay under ~40 MiB (v7x-safe).
    max_tile_rows = ((40 << 20) // (6 * _LANES * itemsize)) // _SUBLANES * _SUBLANES
    tile_rows = max(_SUBLANES, min(_round_up(int(tile_rows), _SUBLANES), max_tile_rows))

    n = int(x.size)
    rows = _cdiv(n, _LANES)
    # Small inputs: shrink the tile to the whole (padded) array -> grid (1, 1).
    tile_rows = min(tile_rows, _round_up(rows, _SUBLANES))

    n_blocks = _cdiv(rows, tile_rows)
    n_outer = 2 if n_blocks >= 2 else 1       # lets v7x shard across its 2 TCs
    n_inner = _cdiv(n_blocks, n_outer)
    padded_rows = n_outer * n_inner * tile_rows
    padded_n = padded_rows * _LANES

    def _prep(a):
        a = a.reshape(-1)
        if padded_n != n:
            # Zero padding contributes exp(0) * 0 == 0 to the sum.
            a = jnp.pad(a, (0, padded_n - n))
        return a.reshape(padded_rows, _LANES)

    x2, y2, d2 = _prep(x), _prep(y), _prep(D)

    in_spec = pl.BlockSpec(
        (tile_rows, _LANES), lambda i, j: (i * n_inner + j, 0)
    )
    out_spec = pl.BlockSpec((1, _LANES), lambda i, j: (i, 0))

    bytes_in = sum(
        int(a.size) * jnp.dtype(a.dtype).itemsize for a in (x2, y2, d2)
    )
    cost = pl.CostEstimate(
        flops=2 * padded_n,
        transcendentals=padded_n,
        bytes_accessed=bytes_in + n_outer * _LANES * 4,
    )

    tile_bytes = tile_rows * _LANES * itemsize
    vmem_needed = 3 * 2 * tile_bytes + (2 << 20)
    vmem_limit = int(min(48 << 20, max(vmem_needed, 16 << 20)))

    partials = pl.pallas_call(
        _exp_loss_kernel,
        out_shape=jax.ShapeDtypeStruct((n_outer, _LANES), jnp.float32),
        grid_spec=pltpu.PrefetchScalarGridSpec(
            num_scalar_prefetch=0,
            grid=(n_outer, n_inner),
            in_specs=[in_spec, in_spec, in_spec],
            out_specs=out_spec,
            scratch_shapes=[pltpu.VMEM((_SUBLANES, _LANES), jnp.float32)],
        ),
        compiler_params=pltpu.CompilerParams(
            dimension_semantics=("parallel", "arbitrary"),
            vmem_limit_bytes=vmem_limit,
        ),
        cost_estimate=cost,
    )(x2, y2, d2)

    return jnp.sum(partials) * scale


def exponential_loss_ref(x, y, D, train_dataset_len):
    a = jnp.exp(-(x.astype(jnp.float32) * y.astype(jnp.float32)))
    a = a * D.astype(jnp.float32)
    return jnp.sum(a) * (train_dataset_len / x.shape[0])


if __name__ == "__main__":
    key = jax.random.PRNGKey(0)
    train_dataset_len = 1000  # args.train_dataset_len (deterministic in-script)

    # --- test 1: small, nicely shaped (single-block fast path) ---------------
    kx, ky, kd = jax.random.split(key, 3)
    B, F = 16, 128
    x = jax.random.normal(kx, (B, F), dtype=jnp.float32)
    y = jnp.sign(jax.random.normal(ky, (B, F), dtype=jnp.float32))
    D = jax.random.uniform(kd, (B, F), dtype=jnp.float32)

    out = jax.block_until_ready(exponential_loss(x, y, D, train_dataset_len))
    ref = exponential_loss_ref(x, y, D, train_dataset_len)
    assert jnp.allclose(out, ref, rtol=1e-5, atol=1e-5), (out, ref)

    # --- test 2: ragged shape (exercises zero-padding of the tail) -----------
    k2 = jax.random.split(key, 6)
    B2, F2 = 10, 200  # 2000 elems, not a multiple of 128
    x2 = jax.random.normal(k2[0], (B2, F2), dtype=jnp.float32)
    y2 = jnp.sign(jax.random.normal(k2[1], (B2, F2), dtype=jnp.float32))
    D2 = jax.random.uniform(k2[2], (B2, F2), dtype=jnp.float32)

    out2 = jax.block_until_ready(exponential_loss(x2, y2, D2, train_dataset_len))
    ref2 = exponential_loss_ref(x2, y2, D2, train_dataset_len)
    assert jnp.allclose(out2, ref2, rtol=1e-5, atol=1e-5), (out2, ref2)

    # --- test 3: multi-block path (2-D grid with parallel outer axis) --------
    B3, F3 = 64, 128
    x3 = jax.random.normal(k2[3], (B3, F3), dtype=jnp.float32)
    y3 = jnp.sign(jax.random.normal(k2[4], (B3, F3), dtype=jnp.float32))
    D3 = jax.random.uniform(k2[5], (B3, F3), dtype=jnp.float32)

    out3 = jax.block_until_ready(
        exponential_loss(x3, y3, D3, train_dataset_len, tile_rows=8)
    )
    ref3 = exponential_loss_ref(x3, y3, D3, train_dataset_len)
    assert jnp.allclose(out3, ref3, rtol=1e-5, atol=1e-5), (out3, ref3)

    print("KERNEL_OK")
</pallas_src>

<mosaic_0001>
module attributes {stable_mosaic.version = 11 : i64} {
  func.func @_exp_loss_kernel(%arg0: i32, %arg1: i32, %arg2: memref<16x128xf32, #tpu.memory_space<vmem>>, %arg3: memref<16x128xf32, #tpu.memory_space<vmem>>, %arg4: memref<16x128xf32, #tpu.memory_space<vmem>>, %arg5: memref<1x128xf32, #tpu.memory_space<vmem>>, %arg6: memref<8x128xf32, #tpu.memory_space<vmem>>) attributes {dimension_semantics = [#tpu.dimension_semantics<parallel>, #tpu.dimension_semantics<arbitrary>], iteration_bounds = array<i64: 1, 1>, scalar_prefetch = 0 : i64, scratch_operands = 1 : i64, tpu.core_type = #tpu.core_type<tc>, window_params = [{transform_indices = @transform_0, window_bounds = array<i64: 16, 128>}, {transform_indices = @transform_1, window_bounds = array<i64: 16, 128>}, {transform_indices = @transform_2, window_bounds = array<i64: 16, 128>}, {transform_indices = @transform_3, window_bounds = array<i64: 1, 128>}]} {
    %c0_i32 = arith.constant 0 : i32
    %0 = arith.cmpi eq, %arg1, %c0_i32 : i32
    %1 = arith.extui %0 : i1 to i32
    %c0_i32_0 = arith.constant 0 : i32
    %2 = arith.cmpi ne, %1, %c0_i32_0 : i32
    scf.if %2 {
      %cst_13 = arith.constant 0.000000e+00 : f32
      %19 = vector.broadcast %cst_13 : f32 to vector<8x128xf32>
      %c0_14 = arith.constant 0 : index
      %c0_15 = arith.constant 0 : index
      %20 = vector.load %arg6[%c0_14, %c0_15] : memref<8x128xf32, #tpu.memory_space<vmem>>, vector<8x128xf32>
      tpu.vector_store %arg6[%c0_14, %c0_15], %19 {strides = array<i32>} : memref<8x128xf32, #tpu.memory_space<vmem>>, vector<8x128xf32>,
    } else {
    }
    %c0 = arith.constant 0 : index
    %c0_1 = arith.constant 0 : index
    %3 = vector.load %arg2[%c0, %c0_1] : memref<16x128xf32, #tpu.memory_space<vmem>>, vector<16x128xf32>
    %c0_2 = arith.constant 0 : index
    %c0_3 = arith.constant 0 : index
    %4 = vector.load %arg3[%c0_2, %c0_3] : memref<16x128xf32, #tpu.memory_space<vmem>>, vector<16x128xf32>
    %c0_4 = arith.constant 0 : index
    %c0_5 = arith.constant 0 : index
    %5 = vector.load %arg4[%c0_4, %c0_5] : memref<16x128xf32, #tpu.memory_space<vmem>>, vector<16x128xf32>
    %6 = arith.mulf %3, %4 : vector<16x128xf32>
    %cst = arith.constant 0.000000e+00 : f32
    %7 = vector.broadcast %cst : f32 to vector<16x128xf32>
    %8 = arith.subf %7, %6 : vector<16x128xf32>
    %9 = math.exp %8 : vector<16x128xf32>
    %10 = arith.mulf %9, %5 : vector<16x128xf32>
    %c0_6 = arith.constant 0 : index
    %c0_7 = arith.constant 0 : index
    %11 = vector.load %arg6[%c0_6, %c0_7] : memref<8x128xf32, #tpu.memory_space<vmem>>, vector<8x128xf32>
    %12 = vector.shape_cast %10 : vector<16x128xf32> to vector<2x8x128xf32>
    %cst_8 = arith.constant dense<0.000000e+00> : vector<8x128xf32>
    %13 = vector.multi_reduction <add>, %12, %cst_8 [0] : vector<2x8x128xf32> to vector<8x128xf32>
    %14 = arith.addf %11, %13 : vector<8x128xf32>
    %c0_9 = arith.constant 0 : index
    %c0_10 = arith.constant 0 : index
    %15 = vector.load %arg6[%c0_9, %c0_10] : memref<8x128xf32, #tpu.memory_space<vmem>>, vector<8x128xf32>
    tpu.vector_store %arg6[%c0_9, %c0_10], %14 {strides = array<i32>} : memref<8x128xf32, #tpu.memory_space<vmem>>, vector<8x128xf32>,
    %c0_i32_11 = arith.constant 0 : i32
    %16 = arith.cmpi eq, %arg1, %c0_i32_11 : i32
    %17 = arith.extui %16 : i1 to i32
    %c0_i32_12 = arith.constant 0 : i32
    %18 = arith.cmpi ne, %17, %c0_i32_12 : i32
    scf.if %18 {
      %c0_13 = arith.constant 0 : index
      %c0_14 = arith.constant 0 : index
      %19 = vector.load %arg6[%c0_13, %c0_14] : memref<8x128xf32, #tpu.memory_space<vmem>>, vector<8x128xf32>
      %cst_15 = arith.constant dense<0.000000e+00> : vector<128xf32>
      %20 = vector.multi_reduction <add>, %19, %cst_15 [0] : vector<8x128xf32> to vector<128xf32>
      %21 = vector.shape_cast %20 : vector<128xf32> to vector<1x128xf32>
      %c0_16 = arith.constant 0 : index
      %c0_17 = arith.constant 0 : index
      %22 = vector.load %arg5[%c0_16, %c0_17] : memref<1x128xf32, #tpu.memory_space<vmem>>, vector<1x128xf32>
      tpu.vector_store %arg5[%c0_16, %c0_17], %21 {strides = array<i32>} : memref<1x128xf32, #tpu.memory_space<vmem>>, vector<1x128xf32>,
    } else {
    }
    return
  }
  func.func @transform_0(%arg0: i32, %arg1: i32) -> (i32, i32) {
    %c1_i32 = arith.constant 1 : i32
    %0 = arith.muli %arg0, %c1_i32 : i32
    %1 = arith.addi %0, %arg1 : i32
    %c0_i32 = arith.constant 0 : i32
    %c0_i32_0 = arith.constant 0 : i32
    return %1, %c0_i32 : i32, i32
  }
  func.func @transform_1(%arg0: i32, %arg1: i32) -> (i32, i32) {
    %c1_i32 = arith.constant 1 : i32
    %0 = arith.muli %arg0, %c1_i32 : i32
    %1 = arith.addi %0, %arg1 : i32
    %c0_i32 = arith.constant 0 : i32
    %c0_i32_0 = arith.constant 0 : i32
    return %1, %c0_i32 : i32, i32
  }
  func.func @transform_2(%arg0: i32, %arg1: i32) -> (i32, i32) {
    %c1_i32 = arith.constant 1 : i32
    %0 = arith.muli %arg0, %c1_i32 : i32
    %1 = arith.addi %0, %arg1 : i32
    %c0_i32 = arith.constant 0 : i32
    %c0_i32_0 = arith.constant 0 : i32
    return %1, %c0_i32 : i32, i32
  }
  func.func @transform_3(%arg0: i32, %arg1: i32) -> (i32, i32) {
    %c0_i32 = arith.constant 0 : i32
    %c0_i32_0 = arith.constant 0 : i32
    return %arg0, %c0_i32 : i32, i32
  }
}

</mosaic_0001>

<bundles_post_ra>
// kernel: tpu_custom_call.1
= control target key start
LH: loop header
LB: loop body
LE: loop exit
PB: predicated region body
PF: predicated region fallthrough
CT: control target
= control target key end

     0   :  { %8 = vsyncpa [#allocation4], 0  ;;  %s320_s0 = inlined_call_operand.hbm [shape: f32[16,128], index: 0, kind: input, shape index: {}]   ;;  %s321_s1 = inlined_call_operand.hbm [shape: f32[16,128], index: 1, kind: input, shape index: {}]   ;;  %s322_s2 = inlined_call_operand.hbm [shape: f32[16,128], index: 2, kind: input, shape index: {}]   ;;  %s323_s3 = inlined_call_operand.hbm [shape: f32[1,128], index: 3, kind: output, shape index: {}]  }
   0x1   :  { %9 = vsyncpa [#allocation7], 0 }
   0x2   :  { %10 = vsyncpa [#allocation5], 0  ;;  %s230_s12 = smov [#allocation6]   ;;  %s231_s14 = smov [#allocation3]  }
   0x3   :  { %s36_s13 = sshll.u32 %s230_s12, 4  ;;  %s20_s15 = sshll.u32 %s231_s14, 4  ;;  %s37_s13 = int_to_ptr.vmem [resolvable:$true] %s36_s13  ;;  %s256_s15 = int_to_ptr.vmem [resolvable:$true] %s20_s15 }
   0x4   :  { %s136_s18 = scalar_lea.hbm %s321_s1, 256 }
   0x5   :  { %p137_p0 = scmp.ne.s32.totalorder %s321_s1, %s136_s18  ;;  %p140_p1 = scmp.lt.u32.totalorder %s136_s18, %s321_s1 }
   0x7   :  { %p142_p2 = pnand %p140_p1, %p137_p0 }
   0x9   :  { %145 = shalt.err (!%p142_p2)
}
   0xa   :  { %s146_s23 = scalar_lea.vmem %s37_s13, 256  ;;  %p151_p4 = scmp.lt.s32.totalorder %s37_s13, %s37_s13 }
   0xb   :  { %p147_p3 = scmp.ne.s32.totalorder %s37_s13, %s146_s23  ;;  %p152_p5 = scmp.lt.s32.totalorder %s146_s23, %s146_s23 }
   0xd   :  { %p153_p6 = por %p152_p5, %p151_p4 }
   0xf   :  { %p154_p7 = pnand %p153_p6, %p147_p3 }
  0x11   :  { %157 = shalt.err (!%p154_p7)
}
  0x12   :  { %s232_s24 = smov 128   ;;  %s233_s25 = smov 8  }
  0x13   :  { %42 = dma.hbm_to_vmem [thread:$0]  %s321_s1, 256, %s37_s13, [#allocation7], %s232_s24, %s232_s24, %s233_s25  }
  0x14   :  { %s158_s30 = scalar_lea.hbm %s320_s0, 256 }
  0x15   :  { %p159_p8 = scmp.ne.s32.totalorder %s320_s0, %s158_s30  ;;  %p162_p9 = scmp.lt.u32.totalorder %s158_s30, %s320_s0 }
  0x17   :  { %p164_p10 = pnand %p162_p9, %p159_p8 }
  0x19   :  { %167 = shalt.err (!%p164_p10)
}
  0x1a   :  { %s168_s8 = scalar_lea.vmem %s256_s15, 256  ;;  %p173_p12 = scmp.lt.s32.totalorder %s256_s15, %s256_s15 }
  0x1b   :  { %p169_p11 = scmp.ne.s32.totalorder %s256_s15, %s168_s8  ;;  %p174_p13 = scmp.lt.s32.totalorder %s168_s8, %s168_s8 }
  0x1d   :  { %p175_p0 = por %p174_p13, %p173_p12 }
  0x1f   :  { %p176_p1 = pnand %p175_p0, %p169_p11 }
  0x21   :  { %179 = shalt.err (!%p176_p1)
}
  0x22   :  { %26 = dma.hbm_to_vmem [thread:$0]  %s320_s0, 256, %s256_s15, [#allocation4], %s232_s24, %s232_s24, %s233_s25  }
  0x23   :  { %s234_s10 = smov [#allocation8]   ;;  %s180_s14 = scalar_lea.hbm %s322_s2, 256 }
  0x24   :  { %s52_s11 = sshll.u32 %s234_s10, 4  ;;  %p181_p2 = scmp.ne.s32.totalorder %s322_s2, %s180_s14  ;;  %s53_s11 = int_to_ptr.vmem [resolvable:$true] %s52_s11 }
  0x25   :  { %p184_p3 = scmp.lt.u32.totalorder %s180_s14, %s322_s2 }
  0x27   :  { %p186_p4 = pnand %p184_p3, %p181_p2 }
  0x29   :  { %189 = shalt.err (!%p186_p4)
}
  0x2a   :  { %s190_s20 = scalar_lea.vmem %s53_s11, 256  ;;  %p195_p6 = scmp.lt.s32.totalorder %s53_s11, %s53_s11 }
  0x2b   :  { %p191_p5 = scmp.ne.s32.totalorder %s53_s11, %s190_s20  ;;  %p196_p7 = scmp.lt.s32.totalorder %s190_s20, %s190_s20 }
  0x2d   :  { %p197_p8 = por %p196_p7, %p195_p6 }
  0x2f   :  { %p198_p9 = pnand %p197_p8, %p191_p5 }
  0x31   :  { %201 = shalt.err (!%p198_p9)
}
  0x32   :  { %58 = dma.hbm_to_vmem [thread:$0]  %s322_s2, 256, %s53_s11, [#allocation7], %s232_s24, %s232_s24, %s233_s25  }
  0x33   :  { %224 = dma.done.wait [#allocation4], 256  }
  0x34   :  { %225 = vsyncadd [#allocation4], 4294967040 }
  0x35   :  { %226 = dma.done.wait [#allocation7], 512  }
  0x36   :  { %227 = vsyncadd [#allocation7], 4294966784  ;;  %v79_v0 = vld [vmem:[#allocation3] sm:$0xff]  ;;  %v80_v1 = vld [vmem:[#allocation3 + $0x8] sm:$0xff]  ;;  %s235_s2 = smov [#allocation9]  }
  0x37   :  { %v81_v2 = vld [vmem:[#allocation6] sm:$0xff]  ;;  %v82_v3 = vld [vmem:[#allocation6 + $0x8] sm:$0xff]  ;;  %v83_v10 = vld [vmem:[#allocation8] sm:$0xff]  ;;  %s116_s21 = sshll.u32 %s235_s2, 4  ;;  %s117_s21 = int_to_ptr.vmem [resolvable:$true] %s116_s21 }
  0x38   :  { %v85_v4 = vmul.f32 %v81_v2, %v79_v0  ;;  %v86_v5 = vmul.f32 %v82_v3, %v80_v1  ;;  %v84_v11 = vld [vmem:[#allocation8 + $0x8] sm:$0xff]  ;;  %s202_s22 = scalar_lea.vmem %s117_s21, 16  ;;  %s206_s23 = scalar_lea.vmem %s117_s21, 32 }
  0x39   :  { %p203_p10 = scmp.ne.s32.totalorder %s117_s21, %s202_s22  ;;  %p207_p11 = scmp.lt.s32.totalorder %s117_s21, %s117_s21 }
  0x3a   :  { %v87_v6 = vsub.f32 0.0, %v85_v4  ;;  %v88_v7 = vsub.f32 0.0, %v86_v5  ;;  %p208_p12 = scmp.lt.s32.totalorder %s206_s23, %s202_s22 }
  0x3c   :  { %v89_v8 = vmul.f32 1.442695, %v87_v6  ;;  %v91_v9 = vmul.f32 1.442695, %v88_v7  ;;  %p209_p13 = por %p208_p12, %p207_p11 }
  0x3e   :  { %132 = vpow2.f32 %v89_v8  ;;  %p210_p0 = pnand %p209_p13, %p203_p10 }
  0x3f   :  { %134 = vpow2.f32 %v91_v9 }
  0x48   :  { %v133_v12 = vpop.eup %132 }
  0x49   :  { %v135_v13 = vpop.eup %134  ;;  %v93_v14 = vmul.f32 %v133_v12, %v83_v10 }
  0x4a   :  { %v94_v15 = vmul.f32 %v135_v13, %v84_v11 }
  0x4c   :  { %v96_v16 = vadd.f32 %v94_v15, %v93_v14 }
  0x4e   :  { %v103_v17 = vrot.slane %v96_v16, 4 }
  0x50   :  { %v104_v18 = vadd.f32 %v103_v17, %v96_v16 }
  0x52   :  { %v105_v19 = vrot.slane %v104_v18, 2 }
  0x54   :  { %v106_v20 = vadd.f32 %v105_v19, %v104_v18 }
  0x56   :  { %v107_v21 = vrot.slane %v106_v20, 1 }
  0x58   :  { %v108_v22 = vadd.f32 %v107_v21, %v106_v20 }
  0x5a   :  { %109 = vst [vmem:[#allocation9] sm:$0x1] %v108_v22 }
  0x5b   :  { %213 = shalt.err (!%p210_p0)
}
  0x5c   :  { %s214_s26 = scalar_lea.hbm %s323_s3, 16 }
  0x5d   :  { %p215_p1 = scmp.ne.s32.totalorder %s323_s3, %s214_s26  ;;  %p218_p2 = scmp.lt.u32.totalorder %s214_s26, %s323_s3 }
  0x5f   :  { %p220_p3 = pnand %p218_p2, %p215_p1 }
  0x61   :  { %223 = shalt.err (!%p220_p3)
}
  0x62   :  { %119 = dma.vmem_to_hbm [thread:$0]  %s117_s21, 16, %s323_s3, [#allocation5]  }
  0x63   :  { %228 = dma.done.wait [#allocation5], 16  }
  0x64   :  { %229 = vsyncadd [#allocation5], 4294967280 }
  0x65   :  { %123 = vsyncpa [#allocation4], 1 }
  0x66   :  { %124 = vsyncpa [#allocation7], 1 }
  0x67   :  { %125 = vsyncpa [#allocation5], 1 }

</bundles_post_ra>
